<compile_context>
chip_gen: v7x
topology: tpu7x:2x2x1
jax: 0.10.0
libtpu: 0.0.40
codegen_flags: <defaults>
</compile_context>

<pallas_src>
import numpy as np
import jax
import jax.numpy as jnp
from jax import lax
from jax.experimental import pallas as pl
from jax.experimental.pallas import tpu as pltpu


# ----------------------------------------------------------------------------
# tiling helpers
# ----------------------------------------------------------------------------
def _pick_tile(total, cap, align):
    """Largest divisor of `total` that is <= cap and a multiple of `align`
    (falls back to `total`, i.e. no tiling, which is always legal)."""
    if total <= cap:
        return total
    d = (cap // align) * align
    while d >= align:
        if total % d == 0:
            return d
        d -= align
    return total  # TODO(synk): pad ragged dims instead of falling back


def _pick_time_tile(t, u1, v):
    """T tile for the joint kernel: keep the (U1, tT, V) f32 temporaries
    (~3 live copies) under ~8 MiB so a tile fits the scoped-VMEM default on
    every TPU generation (v5e 16 MiB / v6e 32 MiB / v7x 32 MiB)."""
    budget_rows = max(1, (8 * 1024 * 1024) // (3 * 4 * u1 * v))
    if t <= budget_rows:
        return t
    return _pick_tile(t, max(128, budget_rows), 128)


# ----------------------------------------------------------------------------
# Kernel 1: tiled dense layer  y = x @ W + b  (classifier, LM proj, LSTM in-proj)
# ----------------------------------------------------------------------------
def _linear_kernel(x_ref, w_ref, b_ref, o_ref):
    o_ref[...] = (
        jnp.dot(x_ref[...], w_ref[...], preferred_element_type=jnp.float32)
        + b_ref[...]
    )


def linear_pallas(x, w, b, *, tm_cap=512, tn_cap=512):
    """Tiled over rows (sublane-aligned) and output columns (lane-aligned);
    MXU operands are cast to bf16 with f32 accumulation (the contraction dim
    is <= 1024 for this model so it is kept whole per tile)."""
    m, k = x.shape
    _, n = w.shape
    tm = _pick_tile(m, tm_cap, 8)
    tn = _pick_tile(n, tn_cap, 128)
    return pl.pallas_call(
        _linear_kernel,
        grid=(m // tm, n // tn),
        out_shape=jax.ShapeDtypeStruct((m, n), jnp.float32),
        in_specs=[
            pl.BlockSpec((tm, k), lambda i, j: (i, 0)),
            pl.BlockSpec((k, tn), lambda i, j: (0, j)),
            pl.BlockSpec((1, tn), lambda i, j: (0, j)),
        ],
        out_specs=pl.BlockSpec((tm, tn), lambda i, j: (i, j)),
        compiler_params=pltpu.CompilerParams(
            dimension_semantics=("parallel", "parallel")),
    )(x.astype(jnp.bfloat16), w.astype(jnp.bfloat16),
      b.reshape(1, n).astype(jnp.float32))


# ----------------------------------------------------------------------------
# Kernel 2: single LSTM layer, input projections hoisted, per-gate weights.
# PyTorch LSTM gate order: i, f, g, o.
# ----------------------------------------------------------------------------
def _lstm_layer_kernel(xp_ref, whh_ref, out_ref):
    # xp_ref:  (U1, 4, N, H)  precomputed x @ Wih + b, split per gate
    # whh_ref: (4, H, H)      recurrent weights, one lane-aligned block per gate
    # out_ref: (U1, N, H)     hidden-state sequence
    u1, n, h = out_ref.shape

    def step(u, carry):
        h_prev, c_prev = carry
        xp = xp_ref[u]                                           # (4, N, H)
        zi = xp[0] + jnp.dot(h_prev, whh_ref[0], preferred_element_type=jnp.float32)
        zf = xp[1] + jnp.dot(h_prev, whh_ref[1], preferred_element_type=jnp.float32)
        zg = xp[2] + jnp.dot(h_prev, whh_ref[2], preferred_element_type=jnp.float32)
        zo = xp[3] + jnp.dot(h_prev, whh_ref[3], preferred_element_type=jnp.float32)
        i_g = jax.nn.sigmoid(zi)
        f_g = jax.nn.sigmoid(zf)
        g_g = jnp.tanh(zg)
        o_g = jax.nn.sigmoid(zo)
        c_new = f_g * c_prev + i_g * g_g
        h_new = o_g * jnp.tanh(c_new)
        out_ref[u] = h_new
        return h_new, c_new

    init = (jnp.zeros((n, h), jnp.float32), jnp.zeros((n, h), jnp.float32))
    lax.fori_loop(0, u1, step, init)


def lstm_layer_pallas(xp, whh_r):
    u1, _, n, h = xp.shape
    return pl.pallas_call(
        _lstm_layer_kernel,
        out_shape=jax.ShapeDtypeStruct((u1, n, h), jnp.float32),
    )(xp, whh_r)


# ----------------------------------------------------------------------------
# Kernel 3: fused joint.  Tiled over (batch, T); per tile computes only
#   lse[t,u]   = logsumexp_v(f[t,v] + g[u,v])
#   blank[u,t] = f[t,0] + g[u,0]            - lse
#   label[u,t] = f[t,tgt_u] + g[u,tgt_u]    - lse   (one-hot contraction on MXU)
# Outputs are lane-dense: (N, U1, T) with T on the lane axis.
# ----------------------------------------------------------------------------
def _joint_kernel(f_ref, g_ref, oh_ref, blank_ref, label_ref):
    f = f_ref[0]                                   # (tT, V) acoustic logits
    g = g_ref[0]                                   # (U1, V) LM logits
    oh = oh_ref[0]                                 # (U1, V) one-hot(targets)
    v = f.shape[-1]

    x = g[:, None, :] + f[None, :, :]              # (U1, tT, V)
    m = jnp.max(x, axis=-1)                        # (U1, tT)
    lse = m + jnp.log(jnp.sum(jnp.exp(x - m[..., None]), axis=-1))

    dnums = (((1,), (1,)), ((), ()))
    f_lbl = lax.dot_general(oh, f, dnums,
                            preferred_element_type=jnp.float32)     # (U1, tT)
    e0 = (lax.broadcasted_iota(jnp.int32, (1, v), 1) == 0).astype(jnp.float32)
    f_blk = lax.dot_general(e0, f, dnums,
                            preferred_element_type=jnp.float32)     # (1, tT)
    g_lbl = jnp.sum(g * oh, axis=-1, keepdims=True)                 # (U1, 1)
    g_blk = g[:, 0:1]                                               # (U1, 1)

    blank_ref[0] = (f_blk + g_blk) - lse
    label_ref[0] = (f_lbl + g_lbl) - lse


def joint_pallas(f_logits, g_logits, onehot):
    n, t, v = f_logits.shape
    u1 = g_logits.shape[1]
    tt = _pick_time_tile(t, u1, v)
    return pl.pallas_call(
        _joint_kernel,
        grid=(n, t // tt),
        out_shape=(jax.ShapeDtypeStruct((n, u1, t), jnp.float32),
                   jax.ShapeDtypeStruct((n, u1, t), jnp.float32)),
        in_specs=[
            pl.BlockSpec((1, tt, v), lambda b, i: (b, i, 0)),
            pl.BlockSpec((1, u1, v), lambda b, i: (b, 0, 0)),   # resident over T
            pl.BlockSpec((1, u1, v), lambda b, i: (b, 0, 0)),   # resident over T
        ],
        out_specs=(pl.BlockSpec((1, u1, tt), lambda b, i: (b, 0, i)),
                   pl.BlockSpec((1, u1, tt), lambda b, i: (b, 0, i))),
        compiler_params=pltpu.CompilerParams(
            dimension_semantics=("parallel", "arbitrary")),
    )(f_logits, g_logits, onehot)


# ----------------------------------------------------------------------------
# Kernel 4: RNNT forward DP as a vectorized anti-diagonal wavefront.
# Inputs are pre-sheared: X_sh[d, n, u] = X[n, t=d-u, u] (clamped gather).
# Only T+U sequential steps; each step is a (N, U1) VPU/EUP vector op.
# ----------------------------------------------------------------------------
_NEG = -1e30  # finite "minus infinity": keeps the log-add NaN-free


def _rnnt_dp_kernel(ilen_ref, tlen_ref, blank_ref, label_ref, term_ref, shift_scr):
    n_diag = blank_ref.shape[0]
    n, u1 = term_ref.shape
    neg = jnp.float32(_NEG)

    u_iota = lax.broadcasted_iota(jnp.int32, (n, u1), 1)
    tlen = tlen_ref[...]                        # (N, 1)
    d_final = ilen_ref[...] + tlen - 1          # (N, 1)
    sel_u = u_iota == tlen                      # (N, U1)

    # column 0 of the shift scratch is a permanent -inf pad; writing the
    # previous diagonal into columns 1..U1 and reading columns 0..U1-1 gives
    # the "u-1" shifted operand without any lane rotate.
    shift_scr[...] = jnp.full(shift_scr.shape, neg, jnp.float32)

    alpha0 = jnp.where(u_iota == 0, jnp.float32(0.0), neg)          # diagonal 0
    term0 = jnp.where((d_final == 0) & sel_u, alpha0 + blank_ref[0], 0.0)

    def step(d, carry):
        prev, term = carry                                          # (N, U1) each
        up = prev + blank_ref[d - 1]
        shift_scr[:, pl.ds(1, u1)] = prev + label_ref[d - 1]
        left = shift_scr[:, pl.ds(0, u1)]
        mx = jnp.maximum(up, left)
        alpha = mx + jnp.log(jnp.exp(up - mx) + jnp.exp(left - mx))
        contrib = jnp.where((d_final == d) & sel_u, alpha + blank_ref[d], 0.0)
        return alpha, term + contrib

    _, term = lax.fori_loop(1, n_diag, step, (alpha0, term0))
    term_ref[...] = term


def rnnt_dp_pallas(input_lengths, target_lengths, blank_sh, label_sh):
    _, n, u1 = blank_sh.shape
    return pl.pallas_call(
        _rnnt_dp_kernel,
        out_shape=jax.ShapeDtypeStruct((n, u1), jnp.float32),
        scratch_shapes=[pltpu.VMEM((n, u1 + 1), jnp.float32)],
    )(input_lengths.reshape(n, 1).astype(jnp.int32),
      target_lengths.reshape(n, 1).astype(jnp.int32),
      blank_sh, label_sh)


# ----------------------------------------------------------------------------
# Transducer forward (matches the PyTorch module's forward semantics)
# ----------------------------------------------------------------------------
def transducer_forward(params, features, targets, input_lengths, target_lengths):
    Wc, bc, emb, Wih0, Whh0, b0, Wih1, Whh1, b1, Wo, bo = params
    N, T, _ = features.shape
    U = targets.shape[1]
    U1 = U + 1
    V = Wc.shape[1]
    H = Whh0.shape[0]

    # acoustic classifier (feature dropout == identity at eval)
    f_logits = linear_pallas(features.reshape(N * T, -1), Wc, bc).reshape(N, T, V)

    # prediction network: embedding lookup (XLA glue) + hoisted input
    # projections (tiled linear kernel) + per-layer recurrent kernel.
    lm_targets = jnp.concatenate(
        [jnp.zeros((N, 1), dtype=targets.dtype), targets], axis=1)    # (N, U1)
    x_emb = emb[lm_targets]                                           # (N, U1, E)
    x_tm = jnp.transpose(x_emb, (1, 0, 2)).reshape(U1 * N, -1)        # time-major

    def gate_split(xp_flat):          # (U1*N, 4H) -> (U1, 4, N, H)
        return jnp.transpose(xp_flat.reshape(U1, N, 4, H), (0, 2, 1, 3))

    def gate_weights(whh):            # (H, 4H) -> (4, H, H)
        return jnp.transpose(whh.reshape(H, 4, H), (1, 0, 2))

    xp0 = gate_split(linear_pallas(x_tm, Wih0, b0))
    h0_seq = lstm_layer_pallas(xp0, gate_weights(Whh0))               # (U1, N, H)
    # inter-layer dropout == identity (eval mode)
    xp1 = gate_split(linear_pallas(h0_seq.reshape(U1 * N, H), Wih1, b1))
    h1_seq = lstm_layer_pallas(xp1, gate_weights(Whh1))               # (U1, N, H)

    hs = jnp.transpose(h1_seq, (1, 0, 2)).reshape(N * U1, H)
    g_logits = linear_pallas(hs, Wo, bo).reshape(N, U1, V)

    # fused joint -> blank / label log-probs, lane-dense (N, U1, T)
    onehot = jax.nn.one_hot(
        jnp.concatenate([targets, jnp.zeros((N, 1), targets.dtype)], axis=1),
        V, dtype=jnp.float32)                                         # (N, U1, V)
    blank_lp, label_lp = joint_pallas(f_logits, g_logits, onehot)

    # shear onto anti-diagonals (XLA gather glue), then wavefront DP kernel
    n_diag = T + U1 - 1
    d_idx = jnp.arange(n_diag)[:, None]
    u_idx = jnp.arange(U1)[None, :]
    t_cl = jnp.clip(d_idx - u_idx, 0, T - 1)                          # (D, U1)
    blank_sh = jnp.transpose(blank_lp[:, u_idx, t_cl], (1, 0, 2))     # (D, N, U1)
    label_sh = jnp.transpose(label_lp[:, u_idx, t_cl], (1, 0, 2))

    term = rnnt_dp_pallas(input_lengths, target_lengths, blank_sh, label_sh)
    loss = -jnp.sum(term) / N                 # reduction='mean' over batch
    return loss, {}


# ----------------------------------------------------------------------------
# Deterministic parameter init (shapes mirror the nn.Module, scaled down)
# ----------------------------------------------------------------------------
def init_params(key, feat_dim, vocab_size, emb_dim, hidden_dim):
    ks = jax.random.split(key, 11)

    def u(k, shape, scale):
        return jax.random.uniform(k, shape, jnp.float32, -scale, scale)

    s_c = 1.0 / np.sqrt(feat_dim)
    s_h = 1.0 / np.sqrt(hidden_dim)
    return (
        u(ks[0], (feat_dim, vocab_size), s_c),        # classifier W
        u(ks[1], (vocab_size,), s_c),                 # classifier b
        u(ks[2], (vocab_size, emb_dim), 0.1),         # embedding
        u(ks[3], (emb_dim, 4 * hidden_dim), s_h),     # LSTM l0 W_ih
        u(ks[4], (hidden_dim, 4 * hidden_dim), s_h),  # LSTM l0 W_hh
        u(ks[5], (4 * hidden_dim,), s_h),             # LSTM l0 bias (b_ih+b_hh)
        u(ks[6], (hidden_dim, 4 * hidden_dim), s_h),  # LSTM l1 W_ih
        u(ks[7], (hidden_dim, 4 * hidden_dim), s_h),  # LSTM l1 W_hh
        u(ks[8], (4 * hidden_dim,), s_h),             # LSTM l1 bias
        u(ks[9], (hidden_dim, vocab_size), s_h),      # LM output W
        u(ks[10], (vocab_size,), s_h),                # LM output b
    )


# ----------------------------------------------------------------------------
# Pure JAX / numpy reference (same math) for a sanity check
# ----------------------------------------------------------------------------
def reference_loss(params, features, targets, input_lengths, target_lengths):
    Wc, bc, emb, Wih0, Whh0, b0, Wih1, Whh1, b1, Wo, bo = params
    N, T, D = features.shape
    U = targets.shape[1]
    U1 = U + 1
    V = Wc.shape[1]
    H = Whh0.shape[0]

    f_logits = (features.reshape(N * T, D) @ Wc + bc).reshape(N, T, V)
    lm_targets = jnp.concatenate([jnp.zeros((N, 1), targets.dtype), targets], 1)
    x = emb[lm_targets]

    def gates(z):
        return (jax.nn.sigmoid(z[:, :H]), jax.nn.sigmoid(z[:, H:2 * H]),
                jnp.tanh(z[:, 2 * H:3 * H]), jax.nn.sigmoid(z[:, 3 * H:]))

    h0 = jnp.zeros((N, H)); c0 = jnp.zeros((N, H))
    h1 = jnp.zeros((N, H)); c1 = jnp.zeros((N, H))
    outs = []
    for u_ in range(U1):
        xt = x[:, u_, :]
        i0, f0, g0, o0 = gates(xt @ Wih0 + h0 @ Whh0 + b0)
        c0 = f0 * c0 + i0 * g0
        h0 = o0 * jnp.tanh(c0)
        i1, f1, g1, o1 = gates(h0 @ Wih1 + h1 @ Whh1 + b1)
        c1 = f1 * c1 + i1 * g1
        h1 = o1 * jnp.tanh(c1)
        outs.append(h1)
    hs = jnp.stack(outs, axis=1)
    g_logits = (hs.reshape(N * U1, H) @ Wo + bo).reshape(N, U1, V)

    joint = f_logits[:, :, None, :] + g_logits[:, None, :, :]
    lsm = np.asarray(jax.nn.log_softmax(joint, axis=-1))
    tgt = np.asarray(targets)
    ilen = np.asarray(input_lengths)
    tlen = np.asarray(target_lengths)

    losses = []
    for n in range(N):
        Tn, Un = int(ilen[n]), int(tlen[n])
        alpha = np.zeros((Tn, Un + 1))
        for t in range(Tn):
            for u_ in range(Un + 1):
                if t == 0 and u_ == 0:
                    alpha[t, u_] = 0.0
                elif t == 0:
                    alpha[t, u_] = alpha[0, u_ - 1] + lsm[n, 0, u_ - 1, tgt[n, u_ - 1]]
                elif u_ == 0:
                    alpha[t, u_] = alpha[t - 1, 0] + lsm[n, t - 1, 0, 0]
                else:
                    alpha[t, u_] = np.logaddexp(
                        alpha[t - 1, u_] + lsm[n, t - 1, u_, 0],
                        alpha[t, u_ - 1] + lsm[n, t, u_ - 1, tgt[n, u_ - 1]])
        losses.append(-(alpha[Tn - 1, Un] + lsm[n, Tn - 1, Un, 0]))
    return float(np.mean(losses))


if __name__ == "__main__":
    # small shapes consistent with the module: features (N, T, feat_dim)
    N, T, U = 2, 8, 4
    D, V, E, H = 128, 32, 32, 32

    key = jax.random.PRNGKey(0)
    kp, kf, kt = jax.random.split(key, 3)
    params = init_params(kp, D, V, E, H)

    features = jax.random.normal(kf, (N, T, D), jnp.float32)
    targets = jax.random.randint(kt, (N, U), 1, V, dtype=jnp.int32)  # no blanks
    input_lengths = jnp.array([T, T - 2], jnp.int32)
    target_lengths = jnp.array([U, U - 1], jnp.int32)

    fwd = jax.jit(transducer_forward)
    loss, _ = fwd(params, features, targets, input_lengths, target_lengths)
    loss = jax.block_until_ready(loss)

    ref = reference_loss(params, features, targets, input_lengths, target_lengths)
    assert np.isfinite(float(loss)), "loss is not finite"
    assert abs(float(loss) - ref) <= 2e-2 * (1.0 + abs(ref)), (float(loss), ref)
    print("KERNEL_OK")
</pallas_src>

<mosaic_0001>
module attributes {stable_mosaic.version = 11 : i64} {
  func.func @_linear_kernel(%arg0: i32, %arg1: i32, %arg2: memref<10x32xbf16, #tpu.memory_space<vmem>>, %arg3: memref<32x128xbf16, #tpu.memory_space<vmem>>, %arg4: memref<1x128xf32, #tpu.memory_space<vmem>>, %arg5: memref<10x128xf32, #tpu.memory_space<vmem>>) attributes {dimension_semantics = [#tpu.dimension_semantics<parallel>, #tpu.dimension_semantics<parallel>], iteration_bounds = array<i64: 1, 1>, scalar_prefetch = 0 : i64, scratch_operands = 0 : i64, tpu.core_type = #tpu.core_type<tc>, window_params = [{transform_indices = @transform_0, window_bounds = array<i64: 10, 32>}, {transform_indices = @transform_1, window_bounds = array<i64: 32, 128>}, {transform_indices = @transform_2, window_bounds = array<i64: 1, 128>}, {transform_indices = @transform_3, window_bounds = array<i64: 10, 128>}]} {
    %c0 = arith.constant 0 : index
    %c0_0 = arith.constant 0 : index
    %0 = vector.load %arg2[%c0, %c0_0] : memref<10x32xbf16, #tpu.memory_space<vmem>>, vector<10x32xbf16>
    %c0_1 = arith.constant 0 : index
    %c0_2 = arith.constant 0 : index
    %1 = vector.load %arg3[%c0_1, %c0_2] : memref<32x128xbf16, #tpu.memory_space<vmem>>, vector<32x128xbf16>
    %cst = arith.constant dense<0.000000e+00> : vector<10x128xf32>
    %2 = tpu.matmul %0, %1, %cst {dimension_numbers = #tpu.dot_dimension_numbers<[1], [0], [0], [1], [0, 0, 1, 1], [], []>} : vector<10x32xbf16>, vector<32x128xbf16>, vector<10x128xf32> -> vector<10x128xf32>
    %c0_3 = arith.constant 0 : index
    %c0_4 = arith.constant 0 : index
    %3 = vector.load %arg4[%c0_3, %c0_4] : memref<1x128xf32, #tpu.memory_space<vmem>>, vector<1x128xf32>
    %4 = vector.broadcast %3 : vector<1x128xf32> to vector<10x128xf32>
    %5 = arith.addf %2, %4 : vector<10x128xf32>
    %c0_5 = arith.constant 0 : index
    %c0_6 = arith.constant 0 : index
    %6 = vector.load %arg5[%c0_5, %c0_6] : memref<10x128xf32, #tpu.memory_space<vmem>>, vector<10x128xf32>
    tpu.vector_store %arg5[%c0_5, %c0_6], %5 {strides = array<i32>} : memref<10x128xf32, #tpu.memory_space<vmem>>, vector<10x128xf32>,
    return
  }
  func.func @transform_0(%arg0: i32, %arg1: i32) -> (i32, i32) {
    %c0_i32 = arith.constant 0 : i32
    %c0_i32_0 = arith.constant 0 : i32
    return %arg0, %c0_i32 : i32, i32
  }
  func.func @transform_1(%arg0: i32, %arg1: i32) -> (i32, i32) {
    %c0_i32 = arith.constant 0 : i32
    %c0_i32_0 = arith.constant 0 : i32
    return %c0_i32, %arg1 : i32, i32
  }
  func.func @transform_2(%arg0: i32, %arg1: i32) -> (i32, i32) {
    %c0_i32 = arith.constant 0 : i32
    %c0_i32_0 = arith.constant 0 : i32
    return %c0_i32, %arg1 : i32, i32
  }
  func.func @transform_3(%arg0: i32, %arg1: i32) -> (i32, i32) {
    %c0_i32 = arith.constant 0 : i32
    return %arg0, %arg1 : i32, i32
  }
}

module attributes {stable_mosaic.version = 11 : i64} {
  func.func @_lstm_layer_kernel(%arg0: memref<5x4x2x32xf32, #tpu.memory_space<vmem>>, %arg1: memref<4x32x32xf32, #tpu.memory_space<vmem>>, %arg2: memref<5x2x32xf32, #tpu.memory_space<vmem>>) attributes {dimension_semantics = [], scalar_prefetch = 0 : i64, scratch_operands = 0 : i64, tpu.core_type = #tpu.core_type<tc>} {
    %cst = arith.constant 0.000000e+00 : f32
    %0 = vector.broadcast %cst : f32 to vector<2x32xf32>
    %cst_0 = arith.constant 0.000000e+00 : f32
    %1 = vector.broadcast %cst_0 : f32 to vector<2x32xf32>
    %c0_i32 = arith.constant 0 : i32
    %c5_i32 = arith.constant 5 : i32
    %2 = arith.addi %c0_i32, %c5_i32 : i32
    %c1_i32 = arith.constant 1 : i32
    %3:2 = scf.for %arg3 = %c0_i32 to %2 step %c1_i32 iter_args(%arg4 = %0, %arg5 = %1) -> (vector<2x32xf32>, vector<2x32xf32>)  : i32 {
      %4 = arith.index_cast %arg3 : i32 to index
      %c0 = arith.constant 0 : index
      %c0_2 = arith.constant 0 : index
      %c0_3 = arith.constant 0 : index
      %5 = vector.load %arg0[%4, %c0, %c0_2, %c0_3] : memref<5x4x2x32xf32, #tpu.memory_space<vmem>>, vector<1x4x2x32xf32>
      %6 = vector.shape_cast %5 : vector<1x4x2x32xf32> to vector<4x2x32xf32>
      %7 = vector.extract_strided_slice %6 {offsets = [0, 0, 0], sizes = [1, 2, 32], strides = [1, 1, 1]} : vector<4x2x32xf32> to vector<1x2x32xf32>
      %8 = vector.shape_cast %7 : vector<1x2x32xf32> to vector<2x32xf32>
      %c0_4 = arith.constant 0 : index
      %c0_5 = arith.constant 0 : index
      %c0_6 = arith.constant 0 : index
      %9 = vector.load %arg1[%c0_4, %c0_5, %c0_6] : memref<4x32x32xf32, #tpu.memory_space<vmem>>, vector<1x32x32xf32>
      %10 = vector.shape_cast %9 : vector<1x32x32xf32> to vector<32x32xf32>
      %cst_7 = arith.constant dense<0.000000e+00> : vector<2x32xf32>
      %11 = tpu.matmul %arg4, %10, %cst_7 {dimension_numbers = #tpu.dot_dimension_numbers<[1], [0], [0], [1], [0, 0, 1, 1], [], []>} : vector<2x32xf32>, vector<32x32xf32>, vector<2x32xf32> -> vector<2x32xf32>
      %12 = arith.addf %8, %11 : vector<2x32xf32>
      %13 = vector.extract_strided_slice %6 {offsets = [1, 0, 0], sizes = [1, 2, 32], strides = [1, 1, 1]} : vector<4x2x32xf32> to vector<1x2x32xf32>
      %14 = vector.shape_cast %13 : vector<1x2x32xf32> to vector<2x32xf32>
      %c1 = arith.constant 1 : index
      %c0_8 = arith.constant 0 : index
      %c0_9 = arith.constant 0 : index
      %15 = vector.load %arg1[%c1, %c0_8, %c0_9] : memref<4x32x32xf32, #tpu.memory_space<vmem>>, vector<1x32x32xf32>
      %16 = vector.shape_cast %15 : vector<1x32x32xf32> to vector<32x32xf32>
      %cst_10 = arith.constant dense<0.000000e+00> : vector<2x32xf32>
      %17 = tpu.matmul %arg4, %16, %cst_10 {dimension_numbers = #tpu.dot_dimension_numbers<[1], [0], [0], [1], [0, 0, 1, 1], [], []>} : vector<2x32xf32>, vector<32x32xf32>, vector<2x32xf32> -> vector<2x32xf32>
      %18 = arith.addf %14, %17 : vector<2x32xf32>
      %19 = vector.extract_strided_slice %6 {offsets = [2, 0, 0], sizes = [1, 2, 32], strides = [1, 1, 1]} : vector<4x2x32xf32> to vector<1x2x32xf32>
      %20 = vector.shape_cast %19 : vector<1x2x32xf32> to vector<2x32xf32>
      %c2 = arith.constant 2 : index
      %c0_11 = arith.constant 0 : index
      %c0_12 = arith.constant 0 : index
      %21 = vector.load %arg1[%c2, %c0_11, %c0_12] : memref<4x32x32xf32, #tpu.memory_space<vmem>>, vector<1x32x32xf32>
      %22 = vector.shape_cast %21 : vector<1x32x32xf32> to vector<32x32xf32>
      %cst_13 = arith.constant dense<0.000000e+00> : vector<2x32xf32>
      %23 = tpu.matmul %arg4, %22, %cst_13 {dimension_numbers = #tpu.dot_dimension_numbers<[1], [0], [0], [1], [0, 0, 1, 1], [], []>} : vector<2x32xf32>, vector<32x32xf32>, vector<2x32xf32> -> vector<2x32xf32>
      %24 = arith.addf %20, %23 : vector<2x32xf32>
      %25 = vector.extract_strided_slice %6 {offsets = [3, 0, 0], sizes = [1, 2, 32], strides = [1, 1, 1]} : vector<4x2x32xf32> to vector<1x2x32xf32>
      %26 = vector.shape_cast %25 : vector<1x2x32xf32> to vector<2x32xf32>
      %c3 = arith.constant 3 : index
      %c0_14 = arith.constant 0 : index
      %c0_15 = arith.constant 0 : index
      %27 = vector.load %arg1[%c3, %c0_14, %c0_15] : memref<4x32x32xf32, #tpu.memory_space<vmem>>, vector<1x32x32xf32>
      %28 = vector.shape_cast %27 : vector<1x32x32xf32> to vector<32x32xf32>
      %cst_16 = arith.constant dense<0.000000e+00> : vector<2x32xf32>
      %29 = tpu.matmul %arg4, %28, %cst_16 {dimension_numbers = #tpu.dot_dimension_numbers<[1], [0], [0], [1], [0, 0, 1, 1], [], []>} : vector<2x32xf32>, vector<32x32xf32>, vector<2x32xf32> -> vector<2x32xf32>
      %30 = arith.addf %26, %29 : vector<2x32xf32>
      %31 = arith.negf %12 : vector<2x32xf32>
      %32 = math.exp %31 : vector<2x32xf32>
      %cst_17 = arith.constant 1.000000e+00 : f32
      %33 = vector.broadcast %cst_17 : f32 to vector<2x32xf32>
      %34 = arith.addf %33, %32 : vector<2x32xf32>
      %35 = arith.divf %33, %34 : vector<2x32xf32>
      %36 = arith.negf %18 : vector<2x32xf32>
      %37 = math.exp %36 : vector<2x32xf32>
      %cst_18 = arith.constant 1.000000e+00 : f32
      %38 = vector.broadcast %cst_18 : f32 to vector<2x32xf32>
      %39 = arith.addf %38, %37 : vector<2x32xf32>
      %40 = arith.divf %38, %39 : vector<2x32xf32>
      %41 = math.tanh %24 : vector<2x32xf32>
      %42 = arith.negf %30 : vector<2x32xf32>
      %43 = math.exp %42 : vector<2x32xf32>
      %cst_19 = arith.constant 1.000000e+00 : f32
      %44 = vector.broadcast %cst_19 : f32 to vector<2x32xf32>
      %45 = arith.addf %44, %43 : vector<2x32xf32>
      %46 = arith.divf %44, %45 : vector<2x32xf32>
      %47 = arith.mulf %40, %arg5 : vector<2x32xf32>
      %48 = arith.mulf %35, %41 : vector<2x32xf32>
      %49 = arith.addf %47, %48 : vector<2x32xf32>
      %50 = math.tanh %49 : vector<2x32xf32>
      %51 = arith.mulf %46, %50 : vector<2x32xf32>
      %52 = arith.index_cast %arg3 : i32 to index
      %c0_20 = arith.constant 0 : index
      %c0_21 = arith.constant 0 : index
      %53 = vector.load %arg2[%52, %c0_20, %c0_21] : memref<5x2x32xf32, #tpu.memory_space<vmem>>, vector<1x2x32xf32>
      %54 = vector.shape_cast %53 : vector<1x2x32xf32> to vector<2x32xf32>
      %55 = vector.shape_cast %51 : vector<2x32xf32> to vector<1x2x32xf32>
      tpu.vector_store %arg2[%52, %c0_20, %c0_21], %55 {strides = array<i32>} : memref<5x2x32xf32, #tpu.memory_space<vmem>>, vector<1x2x32xf32>,
      scf.yield %51, %49 : vector<2x32xf32>, vector<2x32xf32>
    }
    %c5_i32_1 = arith.constant 5 : i32
    return
  }
}

module attributes {stable_mosaic.version = 11 : i64} {
  func.func @_linear_kernel(%arg0: i32, %arg1: i32, %arg2: memref<10x32xbf16, #tpu.memory_space<vmem>>, %arg3: memref<32x32xbf16, #tpu.memory_space<vmem>>, %arg4: memref<1x32xf32, #tpu.memory_space<vmem>>, %arg5: memref<10x32xf32, #tpu.memory_space<vmem>>) attributes {dimension_semantics = [#tpu.dimension_semantics<parallel>, #tpu.dimension_semantics<parallel>], iteration_bounds = array<i64: 1, 1>, scalar_prefetch = 0 : i64, scratch_operands = 0 : i64, tpu.core_type = #tpu.core_type<tc>, window_params = [{transform_indices = @transform_0, window_bounds = array<i64: 10, 32>}, {transform_indices = @transform_1, window_bounds = array<i64: 32, 32>}, {transform_indices = @transform_2, window_bounds = array<i64: 1, 32>}, {transform_indices = @transform_3, window_bounds = array<i64: 10, 32>}]} {
    %c0 = arith.constant 0 : index
    %c0_0 = arith.constant 0 : index
    %0 = vector.load %arg2[%c0, %c0_0] : memref<10x32xbf16, #tpu.memory_space<vmem>>, vector<10x32xbf16>
    %c0_1 = arith.constant 0 : index
    %c0_2 = arith.constant 0 : index
    %1 = vector.load %arg3[%c0_1, %c0_2] : memref<32x32xbf16, #tpu.memory_space<vmem>>, vector<32x32xbf16>
    %cst = arith.constant dense<0.000000e+00> : vector<10x32xf32>
    %2 = tpu.matmul %0, %1, %cst {dimension_numbers = #tpu.dot_dimension_numbers<[1], [0], [0], [1], [0, 0, 1, 1], [], []>} : vector<10x32xbf16>, vector<32x32xbf16>, vector<10x32xf32> -> vector<10x32xf32>
    %c0_3 = arith.constant 0 : index
    %c0_4 = arith.constant 0 : index
    %3 = vector.load %arg4[%c0_3, %c0_4] : memref<1x32xf32, #tpu.memory_space<vmem>>, vector<1x32xf32>
    %4 = vector.broadcast %3 : vector<1x32xf32> to vector<10x32xf32>
    %5 = arith.addf %2, %4 : vector<10x32xf32>
    %c0_5 = arith.constant 0 : index
    %c0_6 = arith.constant 0 : index
    %6 = vector.load %arg5[%c0_5, %c0_6] : memref<10x32xf32, #tpu.memory_space<vmem>>, vector<10x32xf32>
    tpu.vector_store %arg5[%c0_5, %c0_6], %5 {strides = array<i32>} : memref<10x32xf32, #tpu.memory_space<vmem>>, vector<10x32xf32>,
    return
  }
  func.func @transform_0(%arg0: i32, %arg1: i32) -> (i32, i32) {
    %c0_i32 = arith.constant 0 : i32
    %c0_i32_0 = arith.constant 0 : i32
    return %arg0, %c0_i32 : i32, i32
  }
  func.func @transform_1(%arg0: i32, %arg1: i32) -> (i32, i32) {
    %c0_i32 = arith.constant 0 : i32
    %c0_i32_0 = arith.constant 0 : i32
    return %c0_i32, %arg1 : i32, i32
  }
  func.func @transform_2(%arg0: i32, %arg1: i32) -> (i32, i32) {
    %c0_i32 = arith.constant 0 : i32
    %c0_i32_0 = arith.constant 0 : i32
    return %c0_i32, %arg1 : i32, i32
  }
  func.func @transform_3(%arg0: i32, %arg1: i32) -> (i32, i32) {
    %c0_i32 = arith.constant 0 : i32
    return %arg0, %arg1 : i32, i32
  }
}

module attributes {stable_mosaic.version = 11 : i64} {
  func.func @_linear_kernel(%arg0: i32, %arg1: i32, %arg2: memref<16x128xbf16, #tpu.memory_space<vmem>>, %arg3: memref<128x32xbf16, #tpu.memory_space<vmem>>, %arg4: memref<1x32xf32, #tpu.memory_space<vmem>>, %arg5: memref<16x32xf32, #tpu.memory_space<vmem>>) attributes {dimension_semantics = [#tpu.dimension_semantics<parallel>, #tpu.dimension_semantics<parallel>], iteration_bounds = array<i64: 1, 1>, scalar_prefetch = 0 : i64, scratch_operands = 0 : i64, tpu.core_type = #tpu.core_type<tc>, window_params = [{transform_indices = @transform_0, window_bounds = array<i64: 16, 128>}, {transform_indices = @transform_1, window_bounds = array<i64: 128, 32>}, {transform_indices = @transform_2, window_bounds = array<i64: 1, 32>}, {transform_indices = @transform_3, window_bounds = array<i64: 16, 32>}]} {
    %c0 = arith.constant 0 : index
    %c0_0 = arith.constant 0 : index
    %0 = vector.load %arg2[%c0, %c0_0] : memref<16x128xbf16, #tpu.memory_space<vmem>>, vector<16x128xbf16>
    %c0_1 = arith.constant 0 : index
    %c0_2 = arith.constant 0 : index
    %1 = vector.load %arg3[%c0_1, %c0_2] : memref<128x32xbf16, #tpu.memory_space<vmem>>, vector<128x32xbf16>
    %cst = arith.constant dense<0.000000e+00> : vector<16x32xf32>
    %2 = tpu.matmul %0, %1, %cst {dimension_numbers = #tpu.dot_dimension_numbers<[1], [0], [0], [1], [0, 0, 1, 1], [], []>} : vector<16x128xbf16>, vector<128x32xbf16>, vector<16x32xf32> -> vector<16x32xf32>
    %c0_3 = arith.constant 0 : index
    %c0_4 = arith.constant 0 : index
    %3 = vector.load %arg4[%c0_3, %c0_4] : memref<1x32xf32, #tpu.memory_space<vmem>>, vector<1x32xf32>
    %4 = vector.broadcast %3 : vector<1x32xf32> to vector<16x32xf32>
    %5 = arith.addf %2, %4 : vector<16x32xf32>
    %c0_5 = arith.constant 0 : index
    %c0_6 = arith.constant 0 : index
    %6 = vector.load %arg5[%c0_5, %c0_6] : memref<16x32xf32, #tpu.memory_space<vmem>>, vector<16x32xf32>
    tpu.vector_store %arg5[%c0_5, %c0_6], %5 {strides = array<i32>} : memref<16x32xf32, #tpu.memory_space<vmem>>, vector<16x32xf32>,
    return
  }
  func.func @transform_0(%arg0: i32, %arg1: i32) -> (i32, i32) {
    %c0_i32 = arith.constant 0 : i32
    %c0_i32_0 = arith.constant 0 : i32
    return %arg0, %c0_i32 : i32, i32
  }
  func.func @transform_1(%arg0: i32, %arg1: i32) -> (i32, i32) {
    %c0_i32 = arith.constant 0 : i32
    %c0_i32_0 = arith.constant 0 : i32
    return %c0_i32, %arg1 : i32, i32
  }
  func.func @transform_2(%arg0: i32, %arg1: i32) -> (i32, i32) {
    %c0_i32 = arith.constant 0 : i32
    %c0_i32_0 = arith.constant 0 : i32
    return %c0_i32, %arg1 : i32, i32
  }
  func.func @transform_3(%arg0: i32, %arg1: i32) -> (i32, i32) {
    %c0_i32 = arith.constant 0 : i32
    return %arg0, %arg1 : i32, i32
  }
}

module attributes {stable_mosaic.version = 11 : i64} {
  func.func @_joint_kernel(%arg0: i32, %arg1: i32, %arg2: memref<1x8x32xf32, #tpu.memory_space<vmem>>, %arg3: memref<1x5x32xf32, #tpu.memory_space<vmem>>, %arg4: memref<1x5x32xf32, #tpu.memory_space<vmem>>, %arg5: memref<1x5x8xf32, #tpu.memory_space<vmem>>, %arg6: memref<1x5x8xf32, #tpu.memory_space<vmem>>) attributes {dimension_semantics = [#tpu.dimension_semantics<parallel>, #tpu.dimension_semantics<arbitrary>], iteration_bounds = array<i64: 2, 1>, scalar_prefetch = 0 : i64, scratch_operands = 0 : i64, tpu.core_type = #tpu.core_type<tc>, window_params = [{transform_indices = @transform_0, window_bounds = array<i64: 1, 8, 32>}, {transform_indices = @transform_1, window_bounds = array<i64: 1, 5, 32>}, {transform_indices = @transform_2, window_bounds = array<i64: 1, 5, 32>}, {transform_indices = @transform_3, window_bounds = array<i64: 1, 5, 8>}, {transform_indices = @transform_4, window_bounds = array<i64: 1, 5, 8>}]} {
    %c0 = arith.constant 0 : index
    %c0_0 = arith.constant 0 : index
    %c0_1 = arith.constant 0 : index
    %0 = vector.load %arg2[%c0, %c0_0, %c0_1] : memref<1x8x32xf32, #tpu.memory_space<vmem>>, vector<1x8x32xf32>
    %1 = vector.shape_cast %0 : vector<1x8x32xf32> to vector<8x32xf32>
    %c0_2 = arith.constant 0 : index
    %c0_3 = arith.constant 0 : index
    %c0_4 = arith.constant 0 : index
    %2 = vector.load %arg3[%c0_2, %c0_3, %c0_4] : memref<1x5x32xf32, #tpu.memory_space<vmem>>, vector<1x5x32xf32>
    %3 = vector.shape_cast %2 : vector<1x5x32xf32> to vector<5x32xf32>
    %c0_5 = arith.constant 0 : index
    %c0_6 = arith.constant 0 : index
    %c0_7 = arith.constant 0 : index
    %4 = vector.load %arg4[%c0_5, %c0_6, %c0_7] : memref<1x5x32xf32, #tpu.memory_space<vmem>>, vector<1x5x32xf32>
    %5 = vector.shape_cast %4 : vector<1x5x32xf32> to vector<5x32xf32>
    %6 = vector.shape_cast %3 : vector<5x32xf32> to vector<5x1x32xf32>
    %7 = vector.shape_cast %1 : vector<8x32xf32> to vector<1x8x32xf32>
    %8 = vector.broadcast %6 : vector<5x1x32xf32> to vector<5x8x32xf32>
    %9 = vector.broadcast %7 : vector<1x8x32xf32> to vector<5x8x32xf32>
    %10 = arith.addf %8, %9 : vector<5x8x32xf32>
    %cst = arith.constant dense<0xFF800000> : vector<5x8xf32>
    %11 = vector.multi_reduction <maximumf>, %10, %cst [2] : vector<5x8x32xf32> to vector<5x8xf32>
    %12 = vector.shape_cast %11 : vector<5x8xf32> to vector<5x8x1xf32>
    %13 = vector.broadcast %12 : vector<5x8x1xf32> to vector<5x8x32xf32>
    %14 = arith.subf %10, %13 : vector<5x8x32xf32>
    %15 = math.exp %14 : vector<5x8x32xf32>
    %cst_8 = arith.constant dense<0.000000e+00> : vector<5x8xf32>
    %16 = vector.multi_reduction <add>, %15, %cst_8 [2] : vector<5x8x32xf32> to vector<5x8xf32>
    %17 = math.log %16 : vector<5x8xf32>
    %18 = arith.addf %11, %17 : vector<5x8xf32>
    %cst_9 = arith.constant dense<0.000000e+00> : vector<5x8xf32>
    %19 = tpu.matmul %5, %1, %cst_9 {dimension_numbers = #tpu.dot_dimension_numbers<[1], [1], [0], [0], [0, 0, 1, 0], [], []>} : vector<5x32xf32>, vector<8x32xf32>, vector<5x8xf32> -> vector<5x8xf32>
    %20 = tpu.iota {dimensions = array<i32: 1>} : vector<1x32xi32>
    %c0_i32 = arith.constant 0 : i32
    %21 = vector.broadcast %c0_i32 : i32 to vector<1x32xi32>
    %22 = arith.cmpi eq, %20, %21 : vector<1x32xi32>
    %23 = arith.extui %22 : vector<1x32xi1> to vector<1x32xi32>
    %24 = arith.sitofp %23 : vector<1x32xi32> to vector<1x32xf32>
    %cst_10 = arith.constant dense<0.000000e+00> : vector<1x8xf32>
    %25 = tpu.matmul %24, %1, %cst_10 {dimension_numbers = #tpu.dot_dimension_numbers<[1], [1], [0], [0], [0, 0, 1, 0], [], []>} : vector<1x32xf32>, vector<8x32xf32>, vector<1x8xf32> -> vector<1x8xf32>
    %26 = arith.mulf %3, %5 : vector<5x32xf32>
    %cst_11 = arith.constant dense<0.000000e+00> : vector<5xf32>
    %27 = vector.multi_reduction <add>, %26, %cst_11 [1] : vector<5x32xf32> to vector<5xf32>
    %28 = vector.shape_cast %27 : vector<5xf32> to vector<5x1xf32>
    %29 = vector.extract_strided_slice %3 {offsets = [0, 0], sizes = [5, 1], strides = [1, 1]} : vector<5x32xf32> to vector<5x1xf32>
    %30 = vector.broadcast %25 : vector<1x8xf32> to vector<5x8xf32>
    %31 = vector.broadcast %29 : vector<5x1xf32> to vector<5x8xf32>
    %32 = arith.addf %30, %31 : vector<5x8xf32>
    %33 = arith.subf %32, %18 : vector<5x8xf32>
    %c0_12 = arith.constant 0 : index
    %c0_13 = arith.constant 0 : index
    %c0_14 = arith.constant 0 : index
    %34 = vector.load %arg5[%c0_12, %c0_13, %c0_14] : memref<1x5x8xf32, #tpu.memory_space<vmem>>, vector<1x5x8xf32>
    %35 = vector.shape_cast %34 : vector<1x5x8xf32> to vector<5x8xf32>
    %36 = vector.shape_cast %33 : vector<5x8xf32> to vector<1x5x8xf32>
    tpu.vector_store %arg5[%c0_12, %c0_13, %c0_14], %36 {strides = array<i32>} : memref<1x5x8xf32, #tpu.memory_space<vmem>>, vector<1x5x8xf32>,
    %37 = vector.broadcast %28 : vector<5x1xf32> to vector<5x8xf32>
    %38 = arith.addf %19, %37 : vector<5x8xf32>
    %39 = arith.subf %38, %18 : vector<5x8xf32>
    %c0_15 = arith.constant 0 : index
    %c0_16 = arith.constant 0 : index
    %c0_17 = arith.constant 0 : index
    %40 = vector.load %arg6[%c0_15, %c0_16, %c0_17] : memref<1x5x8xf32, #tpu.memory_space<vmem>>, vector<1x5x8xf32>
    %41 = vector.shape_cast %40 : vector<1x5x8xf32> to vector<5x8xf32>
    %42 = vector.shape_cast %39 : vector<5x8xf32> to vector<1x5x8xf32>
    tpu.vector_store %arg6[%c0_15, %c0_16, %c0_17], %42 {strides = array<i32>} : memref<1x5x8xf32, #tpu.memory_space<vmem>>, vector<1x5x8xf32>,
    return
  }
  func.func @transform_0(%arg0: i32, %arg1: i32) -> (i32, i32, i32) {
    %c0_i32 = arith.constant 0 : i32
    %c0_i32_0 = arith.constant 0 : i32
    return %arg0, %arg1, %c0_i32 : i32, i32, i32
  }
  func.func @transform_1(%arg0: i32, %arg1: i32) -> (i32, i32, i32) {
    %c0_i32 = arith.constant 0 : i32
    %c0_i32_0 = arith.constant 0 : i32
    %c0_i32_1 = arith.constant 0 : i32
    return %arg0, %c0_i32, %c0_i32_0 : i32, i32, i32
  }
  func.func @transform_2(%arg0: i32, %arg1: i32) -> (i32, i32, i32) {
    %c0_i32 = arith.constant 0 : i32
    %c0_i32_0 = arith.constant 0 : i32
    %c0_i32_1 = arith.constant 0 : i32
    return %arg0, %c0_i32, %c0_i32_0 : i32, i32, i32
  }
  func.func @transform_3(%arg0: i32, %arg1: i32) -> (i32, i32, i32) {
    %c0_i32 = arith.constant 0 : i32
    %c0_i32_0 = arith.constant 0 : i32
    return %arg0, %c0_i32, %arg1 : i32, i32, i32
  }
  func.func @transform_4(%arg0: i32, %arg1: i32) -> (i32, i32, i32) {
    %c0_i32 = arith.constant 0 : i32
    %c0_i32_0 = arith.constant 0 : i32
    return %arg0, %c0_i32, %arg1 : i32, i32, i32
  }
}

module attributes {stable_mosaic.version = 11 : i64} {
  func.func @_rnnt_dp_kernel(%arg0: memref<2x1xi32, #tpu.memory_space<vmem>>, %arg1: memref<2x1xi32, #tpu.memory_space<vmem>>, %arg2: memref<12x2x5xf32, #tpu.memory_space<vmem>>, %arg3: memref<12x2x5xf32, #tpu.memory_space<vmem>>, %arg4: memref<2x5xf32, #tpu.memory_space<vmem>>, %arg5: memref<2x6xf32, #tpu.memory_space<vmem>>) attributes {dimension_semantics = [], scalar_prefetch = 0 : i64, scratch_operands = 1 : i64, tpu.core_type = #tpu.core_type<tc>} {
    %0 = tpu.iota {dimensions = array<i32: 1>} : vector<2x5xi32>
    %c0 = arith.constant 0 : index
    %c0_0 = arith.constant 0 : index
    %1 = vector.load %arg1[%c0, %c0_0] : memref<2x1xi32, #tpu.memory_space<vmem>>, vector<2x1xi32>
    %c0_1 = arith.constant 0 : index
    %c0_2 = arith.constant 0 : index
    %2 = vector.load %arg0[%c0_1, %c0_2] : memref<2x1xi32, #tpu.memory_space<vmem>>, vector<2x1xi32>
    %3 = arith.addi %2, %1 : vector<2x1xi32>
    %c1_i32 = arith.constant 1 : i32
    %4 = vector.broadcast %c1_i32 : i32 to vector<2x1xi32>
    %5 = arith.subi %3, %4 : vector<2x1xi32>
    %6 = vector.broadcast %1 : vector<2x1xi32> to vector<2x5xi32>
    %7 = arith.cmpi eq, %0, %6 : vector<2x5xi32>
    %cst = arith.constant -1.000000e+30 : f32
    %8 = vector.broadcast %cst : f32 to vector<2x6xf32>
    %c0_3 = arith.constant 0 : index
    %c0_4 = arith.constant 0 : index
    %9 = vector.load %arg5[%c0_3, %c0_4] : memref<2x6xf32, #tpu.memory_space<vmem>>, vector<2x6xf32>
    tpu.vector_store %arg5[%c0_3, %c0_4], %8 {strides = array<i32>} : memref<2x6xf32, #tpu.memory_space<vmem>>, vector<2x6xf32>,
    %c0_i32 = arith.constant 0 : i32
    %10 = vector.broadcast %c0_i32 : i32 to vector<2x5xi32>
    %11 = arith.cmpi eq, %0, %10 : vector<2x5xi32>
    %cst_5 = arith.constant 0.000000e+00 : f32
    %cst_6 = arith.constant -1.000000e+30 : f32
    %12 = vector.broadcast %cst_5 : f32 to vector<2x5xf32>
    %13 = vector.broadcast %cst_6 : f32 to vector<2x5xf32>
    %14 = arith.select %11, %12, %13 : vector<2x5xi1>, vector<2x5xf32>
    %c0_i32_7 = arith.constant 0 : i32
    %15 = vector.broadcast %c0_i32_7 : i32 to vector<2x1xi32>
    %16 = arith.cmpi eq, %5, %15 : vector<2x1xi32>
    %17 = vector.broadcast %16 : vector<2x1xi1> to vector<2x5xi1>
    %18 = arith.andi %17, %7 : vector<2x5xi1>
    %c0_8 = arith.constant 0 : index
    %c0_9 = arith.constant 0 : index
    %c0_10 = arith.constant 0 : index
    %19 = vector.load %arg2[%c0_8, %c0_9, %c0_10] : memref<12x2x5xf32, #tpu.memory_space<vmem>>, vector<1x2x5xf32>
    %20 = vector.shape_cast %19 : vector<1x2x5xf32> to vector<2x5xf32>
    %21 = arith.addf %14, %20 : vector<2x5xf32>
    %cst_11 = arith.constant 0.000000e+00 : f32
    %22 = vector.broadcast %cst_11 : f32 to vector<2x5xf32>
    %23 = arith.select %18, %21, %22 : vector<2x5xi1>, vector<2x5xf32>
    %c1_i32_12 = arith.constant 1 : i32
    %c11_i32 = arith.constant 11 : i32
    %24 = arith.addi %c1_i32_12, %c11_i32 : i32
    %c1_i32_13 = arith.constant 1 : i32
    %25:2 = scf.for %arg6 = %c1_i32_12 to %24 step %c1_i32_13 iter_args(%arg7 = %14, %arg8 = %23) -> (vector<2x5xf32>, vector<2x5xf32>)  : i32 {
      %c1_i32_17 = arith.constant 1 : i32
      %27 = arith.subi %arg6, %c1_i32_17 : i32
      %28 = arith.index_cast %27 : i32 to index
      %c0_18 = arith.constant 0 : index
      %c0_19 = arith.constant 0 : index
      %29 = vector.load %arg2[%28, %c0_18, %c0_19] : memref<12x2x5xf32, #tpu.memory_space<vmem>>, vector<1x2x5xf32>
      %30 = vector.shape_cast %29 : vector<1x2x5xf32> to vector<2x5xf32>
      %31 = arith.addf %arg7, %30 : vector<2x5xf32>
      %c1_i32_20 = arith.constant 1 : i32
      %32 = arith.subi %arg6, %c1_i32_20 : i32
      %33 = arith.index_cast %32 : i32 to index
      %c0_21 = arith.constant 0 : index
      %c0_22 = arith.constant 0 : index
      %34 = vector.load %arg3[%33, %c0_21, %c0_22] : memref<12x2x5xf32, #tpu.memory_space<vmem>>, vector<1x2x5xf32>
      %35 = vector.shape_cast %34 : vector<1x2x5xf32> to vector<2x5xf32>
      %36 = arith.addf %arg7, %35 : vector<2x5xf32>
      %c0_23 = arith.constant 0 : index
      %c1 = arith.constant 1 : index
      %37 = vector.load %arg5[%c0_23, %c1] : memref<2x6xf32, #tpu.memory_space<vmem>>, vector<2x5xf32>
      tpu.vector_store %arg5[%c0_23, %c1], %36 {strides = array<i32>} : memref<2x6xf32, #tpu.memory_space<vmem>>, vector<2x5xf32>,
      %c0_24 = arith.constant 0 : index
      %c0_25 = arith.constant 0 : index
      %38 = vector.load %arg5[%c0_24, %c0_25] : memref<2x6xf32, #tpu.memory_space<vmem>>, vector<2x5xf32>
      %39 = arith.maximumf %31, %38 : vector<2x5xf32>
      %40 = arith.subf %31, %39 : vector<2x5xf32>
      %41 = math.exp %40 : vector<2x5xf32>
      %42 = arith.subf %38, %39 : vector<2x5xf32>
      %43 = math.exp %42 : vector<2x5xf32>
      %44 = arith.addf %41, %43 : vector<2x5xf32>
      %45 = math.log %44 : vector<2x5xf32>
      %46 = arith.addf %39, %45 : vector<2x5xf32>
      %47 = vector.broadcast %arg6 : i32 to vector<2x1xi32>
      %48 = arith.cmpi eq, %5, %47 : vector<2x1xi32>
      %49 = vector.broadcast %48 : vector<2x1xi1> to vector<2x5xi1>
      %50 = arith.andi %49, %7 : vector<2x5xi1>
      %51 = arith.index_cast %arg6 : i32 to index
      %c0_26 = arith.constant 0 : index
      %c0_27 = arith.constant 0 : index
      %52 = vector.load %arg2[%51, %c0_26, %c0_27] : memref<12x2x5xf32, #tpu.memory_space<vmem>>, vector<1x2x5xf32>
      %53 = vector.shape_cast %52 : vector<1x2x5xf32> to vector<2x5xf32>
      %54 = arith.addf %46, %53 : vector<2x5xf32>
      %cst_28 = arith.constant 0.000000e+00 : f32
      %55 = vector.broadcast %cst_28 : f32 to vector<2x5xf32>
      %56 = arith.select %50, %54, %55 : vector<2x5xi1>, vector<2x5xf32>
      %57 = arith.addf %arg8, %56 : vector<2x5xf32>
      scf.yield %46, %57 : vector<2x5xf32>, vector<2x5xf32>
    }
    %c11_i32_14 = arith.constant 11 : i32
    %c0_15 = arith.constant 0 : index
    %c0_16 = arith.constant 0 : index
    %26 = vector.load %arg4[%c0_15, %c0_16] : memref<2x5xf32, #tpu.memory_space<vmem>>, vector<2x5xf32>
    tpu.vector_store %arg4[%c0_15, %c0_16], %25#1 {strides = array<i32>} : memref<2x5xf32, #tpu.memory_space<vmem>>, vector<2x5xf32>,
    return
  }
}

</mosaic_0001>

<bundles_post_ra>
// kernel: transducer_forward.9
= control target key start
LH: loop header
LB: loop body
LE: loop exit
PB: predicated region body
PF: predicated region fallthrough
CT: control target
= control target key end

     0   :  { %v117_v0 = vmov 0.0   ;;  %vm118_vm0 = vmmov 0   ;;  %vm45_vm1 = vcmask 261120   ;;  %s157_s1 = inlined_call_operand.vmem [shape: bf16[32,128], index: 1, kind: input, shape index: {}]   ;;  %s158_s0 = inlined_call_operand.vmem [shape: bf16[10,32], index: 0, kind: input, shape index: {}]   ;;  %s159_s2 = inlined_call_operand.vmem [shape: f32[1,128], index: 2, kind: input, shape index: {}]   ;;  %s160_s3 = inlined_call_operand.vmem [shape: f32[10,128], index: 3, kind: output, shape index: {}]  }
   0x1   :  { %104 = vmatprep.subr.bf16.mxu0 %v117_v0  ;;  %v114_v1 = vld [vmem:[%s157_s1] sm:$0xff]   ;;  %108 = vmatprep.mubr.msk.bf16.mxu0 %vm118_vm0, %v117_v0  ;;  %v115_v2 = vld [vmem:[%s157_s1 + $0x8] sm:$0xff]  }
   0x2   :  { %105 = vmatpush3.bf16.msra.mxu0 %v114_v1  ;;  %v116_v3 = vld [vmem:[%s158_s0] sm:$0x1f]  }
   0x3   :  { %106 = vmatprep.subr.bf16.mxu0 %v117_v0  ;;  %v96_v4 = vld [vmem:[%s159_s2] ss:$0 sm:$0xff] }
   0x6   :  { %107 = vmatpush3.bf16.msra.mxu0 %v115_v2 }
   0x9   :  { %109 = vmatmul.mubr.msk.bf16.vlgmr.msra.gmra.mrb[0].mxu0 %vm45_vm1, %v116_v3 }
  0xdc   :  { %v83_v5 = vpop.f32.mrb[0].mxu0 }
  0xdd   :  { %v84_v6 = vadd.f32 %v96_v4, %v83_v5  ;;  %v110_v7 = vpop.f32.mrb[1].mxu0 }
  0xde   :  { %v86_v8 = vpop.f32.mrb[2].mxu0 }
  0xdf   :  { %90 = vst [vmem:[%s160_s3] sm:$0xff] %v84_v6  ;;  %v87_v9 = vadd.f32 %v96_v4, %v86_v8  ;;  %v111_v10 = vpop.f32.mrb[3].mxu0 }
  0xe1   :  { %91 = vst [vmem:[%s160_s3 + $0x8] sm:$0x3] %v87_v9 }

// kernel: transducer_forward.13
= control target key start
LH: loop header
LB: loop body
LE: loop exit
PB: predicated region body
PF: predicated region fallthrough
CT: control target
= control target key end

     0   :  { %v118_v0 = vmov 0.0   ;;  %vm119_vm0 = vmmov 0   ;;  %vm45_vm1 = vcmask 261120   ;;  %vm91_vm2 = vcmask 254976   ;;  %s158_s1 = inlined_call_operand.vmem [shape: bf16[32,32], index: 1, kind: input, shape index: {}]   ;;  %s159_s0 = inlined_call_operand.vmem [shape: bf16[10,32], index: 0, kind: input, shape index: {}]   ;;  %s160_s2 = inlined_call_operand.vmem [shape: f32[1,32], index: 2, kind: input, shape index: {}]   ;;  %s161_s3 = inlined_call_operand.vmem [shape: f32[10,32], index: 3, kind: output, shape index: {}]  }
   0x1   :  { %105 = vmatprep.subr.bf16.mxu0 %v118_v0  ;;  %v115_v1 = vld [vmem:[%s158_s1] sm:$0xff]   ;;  %109 = vmatprep.mubr.msk.bf16.mxu0 %vm119_vm0, %v118_v0  ;;  %v116_v2 = vld [vmem:[%s158_s1 + $0x8] sm:$0xff]  }
   0x2   :  { %106 = vmatpush3.bf16.msra.mxu0 %v115_v1  ;;  %v117_v3 = vld [vmem:[%s159_s0] sm:$0x1f]  }
   0x3   :  { %107 = vmatprep.subr.bf16.mxu0 %v118_v0  ;;  %v97_v4 = vld [vmem:[%s160_s2] ss:$0 sm:$0xff] }
   0x6   :  { %108 = vmatpush3.bf16.msra.mxu0 %v116_v2 }
   0x9   :  { %110 = vmatmul.mubr.msk.bf16.vlgmr.msra.gmra.mrb[0].mxu0 %vm45_vm1, %v117_v3 }
  0xdc   :  { %v83_v5 = vpop.f32.mrb[0].mxu0 }
  0xdd   :  { %v84_v6 = vadd.f32 %v97_v4, %v83_v5  ;;  %v111_v7 = vpop.f32.mrb[1].mxu0 }
  0xde   :  { %v86_v8 = vpop.f32.mrb[2].mxu0 }
  0xdf   :  { %90 = vst.msk [vmem:[%s161_s3] sm:$0xff] %vm45_vm1, %v84_v6  ;;  %v87_v9 = vadd.f32 %v97_v4, %v86_v8  ;;  %v112_v10 = vpop.f32.mrb[3].mxu0 }
  0xe1   :  { %92 = vst.msk [vmem:[%s161_s3 + $0x8] sm:$0x3] %vm91_vm2, %v87_v9 }

// kernel: transducer_forward.10
= control target key start
LH: loop header
LB: loop body
LE: loop exit
PB: predicated region body
PF: predicated region fallthrough
CT: control target
= control target key end

     0   :  { %v573_v0 = vmov 0.0   ;;  %v575_v1 = vmov 0.0   ;;  %s577_s9 = smov 0   ;;  %s658_s0 = inlined_call_operand.vmem [shape: f32[5,4,2,32], index: 0, kind: input, shape index: {}]   ;;  %s659_s1 = inlined_call_operand.vmem [shape: f32[4,32,32], index: 1, kind: input, shape index: {}]   ;;  %s660_s2 = inlined_call_operand.vmem [shape: f32[5,2,32], index: 2, kind: output, shape index: {}]  }
   0x1 LB: > { %v25_v2 = vld [vmem:[%s659_s1] sm:$0xff]  ;;  %v26_v3 = vld [vmem:[%s659_s1 + $0x8] sm:$0xff]  ;;  %v555_v5 = vmov 0.0|0.0   ;;  %v27_v8 = vld [vmem:[%s659_s1 + $0x10] sm:$0xff]  ;;  %vm556_vm0 = vmmov 0   ;;  %v557_v13 = vmov 0.0   ;;  %s553_s9 = sphi %s577_s9, %s16_s9   ;;  %v549_v1 = vphi %v575_v1, %v355_v1   ;;  %v545_v0 = vphi %v573_v0, %v353_v0  }
   0x2   : > { %v381_v4 = vld [vmem:[%s659_s1 + $0x20] sm:$0xff]  ;;  %464 = vmatprep.subr.bf16.mxu0 %v555_v5  ;;  %470 = vmatprep.subr.bf16.mxu1 %v555_v5  ;;  %v465_v6 = vpack.c.bf16 %v26_v3, %v25_v2  ;;  %v382_v7 = vld [vmem:[%s659_s1 + $0x28] sm:$0xff]  ;;  %v28_v9 = vld [vmem:[%s659_s1 + $0x18] sm:$0xff]  ;;  %vm29_vm1 = vcmask 261120   ;;  %s379_s15 = sshll.u32 %s553_s9, 3  ;;  %s399_s19 = sshll.u32 %s553_s9, 1 }
   0x3   : > { %v471_v10 = vpack.c.bf16 %v382_v7, %v381_v4  ;;  %v383_v11 = vld [vmem:[%s659_s1 + $0x30] sm:$0xff]  ;;  %v384_v12 = vld [vmem:[%s659_s1 + $0x38] sm:$0xff]  ;;  %428 = vmatprep.mubr.msk.f32.mxu0 %vm556_vm0, %v557_v13  ;;  %439 = vmatprep.mubr.msk.f32.mxu1 %vm556_vm0, %v557_v13  ;;  %v468_v14 = vpack.c.bf16 %v28_v9, %v27_v8  ;;  %v386_v16 = vld [vmem:[%s659_s1 + $0x40] sm:$0xff]  ;;  %s20_s18 = scalar_lea.vmem %s658_s0, %s379_s15  ;;  %s357_s22 = scalar_lea.vmem %s660_s2, %s399_s19  ;;  %vm358_vm2 = vcmask 254976  }
   0x4   : > { %466 = vmatpush3.bf16.msra.mxu0 %v465_v6  ;;  %v474_v15 = vpack.c.bf16 %v384_v12, %v383_v11  ;;  %v387_v17 = vld [vmem:[%s659_s1 + $0x48] sm:$0xff]  ;;  %v391_v18 = vld [vmem:[%s659_s1 + $0x60] sm:$0xff]  ;;  %v388_v22 = vld [vmem:[%s659_s1 + $0x50] sm:$0xff]  ;;  %s16_s9 = sadd.s32 1, %s553_s9  }
   0x5   : > { %472 = vmatpush3.bf16.msra.mxu1 %v471_v10  ;;  %467 = vmatprep.subr.bf16.mxu0 %v555_v5  ;;  %v392_v19 = vld [vmem:[%s659_s1 + $0x68] sm:$0xff]  ;;  %v477_v20 = vpack.c.bf16 %v387_v17, %v386_v16  ;;  %v389_v23 = vld [vmem:[%s659_s1 + $0x58] sm:$0xff]  ;;  %v393_v24 = vld [vmem:[%s659_s1 + $0x70] sm:$0xff]  ;;  %p13_p0 = scmp.ge.s32.totalorder %s16_s9, 5  }
   0x6   : > { %473 = vmatprep.subr.bf16.mxu1 %v555_v5  ;;  %v483_v21 = vpack.c.bf16 %v392_v19, %v391_v18  ;;  %v394_v25 = vld [vmem:[%s659_s1 + $0x78] sm:$0xff]  ;;  %v480_v26 = vpack.c.bf16 %v389_v23, %v388_v22  ;;  %v21_v28 = vld [vmem:[%s20_s18] sm:$0x3]  ;;  %v22_v29 = vld [vmem:[%s20_s18 + $0x2] sm:$0x3] }
   0x7   : > { %v486_v27 = vpack.c.bf16 %v394_v25, %v393_v24  ;;  %v24_v38 = vld [vmem:[%s20_s18 + $0x6] sm:$0x3]  ;;  %v23_v40 = vld [vmem:[%s20_s18 + $0x4] sm:$0x3] }
   0x8   : > { %469 = vmatpush3.bf16.msra.mxu0 %v468_v14 }
   0x9   : > { %475 = vmatpush3.bf16.msra.mxu1 %v474_v15  ;;  %476 = vmatprep.subr.bf16.mxu0 %v555_v5 }
   0xa   : > { %482 = vmatprep.subr.bf16.mxu1 %v555_v5 }
   0xb   : > { %429 = vmatmul.mubr.msk.f32.vlgmr.msra.gmra.mrb[0].mxu0 %vm29_vm1, %v549_v1 }
   0xc   : > { %440 = vmatmul.mubr.msk.f32.vlgmr.msra.gmra.mrb[0].mxu1 %vm29_vm1, %v549_v1  ;;  %478 = vmatpush3.bf16.msra.mxu0 %v477_v20 }
   0xd   : > { %484 = vmatpush3.bf16.msra.mxu1 %v483_v21  ;;  %479 = vmatprep.subr.bf16.mxu0 %v555_v5 }
   0xe   : > { %485 = vmatprep.subr.bf16.mxu1 %v555_v5  ;;  %450 = vmatprep.mubr.msk.f32.mxu0 %vm556_vm0, %v557_v13 }
   0xf   : > { %461 = vmatprep.mubr.msk.f32.mxu1 %vm556_vm0, %v557_v13 }
  0x10   : > { %481 = vmatpush3.bf16.msra.mxu0 %v480_v26 }
  0x11   : > { %487 = vmatpush3.bf16.msra.mxu1 %v486_v27 }
  0x13   : > { %451 = vmatmul.mubr.msk.f32.vlgmr.msra.gmra.mrb[2].mxu0 %vm29_vm1, %v549_v1 }
  0x14   : > { %462 = vmatmul.mubr.msk.f32.vlgmr.msra.gmra.mrb[2].mxu1 %vm29_vm1, %v549_v1 }
  0xde   : > { %v99_v30 = vpop.f32.mrb[0].mxu0 }
  0xdf   : > { %v103_v31 = vadd.f32 %v99_v30, %v21_v28  ;;  %v175_v32 = vpop.f32.mrb[0].mxu1  ;;  %v430_v33 = vpop.f32.mrb[1].mxu0 }
  0xe0   : > { %v179_v34 = vadd.f32 %v175_v32, %v22_v29  ;;  %v441_v35 = vpop.f32.mrb[1].mxu1 }
  0xe1   : > { %v396_v36 = vmul.f32 -1.442695, %v103_v31 }
  0xe2   : > { %v397_v37 = vmul.f32 -1.442695, %v179_v34 }
  0xe3   : > { %515 = vpow2.f32 %v396_v36 }
  0xe4   : > { %517 = vpow2.f32 %v397_v37 }
  0xe6   : > { %v251_v39 = vpop.f32.mrb[2].mxu0 }
  0xe7   : > { %v327_v41 = vpop.f32.mrb[2].mxu1  ;;  %v452_v42 = vpop.f32.mrb[3].mxu0  ;;  %v255_v45 = vadd.f32 %v251_v39, %v23_v40 }
  0xe8   : > { %v331_v43 = vadd.f32 %v327_v41, %v24_v38  ;;  %v463_v44 = vpop.f32.mrb[3].mxu1 }
  0xea   : > { %v398_v46 = vmul.f32 -1.442695, %v331_v43 }
  0xec   : > { %519 = vpow2.f32 %v398_v46 }
  0xed   : > { %v516_v47 = vpop.eup %515  ;;  %521 = vtanh.f32 %v255_v45 }
  0xee   : > { %v518_v48 = vpop.eup %517  ;;  %v335_v49 = vadd.f32 1.0, %v516_v47 }
  0xef   : > { %v341_v50 = vadd.f32 1.0, %v518_v48 }
  0xf0   : > { %523 = vrcp.f32 %v335_v49 }
  0xf1   : > { %525 = vrcp.f32 %v341_v50 }
  0xf6   : > { %v520_v51 = vpop.eup %519 }
  0xf7   : > { %v522_v52 = vpop.eup %521  ;;  %v348_v54 = vadd.f32 1.0, %v520_v51 }
  0xf9   : > { %527 = vrcp.f32 %v348_v54 }
  0xfa   : > { %v524_v53 = vpop.eup %523 }
  0xfb   : > { %v526_v55 = vpop.eup %525  ;;  %v352_v56 = vmul.f32 %v524_v53, %v522_v52 }
  0xfc   : > { %v351_v57 = vmul.f32 %v545_v0, %v526_v55 }
  0xfe   : > { %v353_v0 = vadd.f32 %v352_v56, %v351_v57  }
 0x100   : > { %529 = vtanh.f32 %v353_v0 }
 0x103   : > { %v528_v58 = vpop.eup %527 }
 0x107   :  { %15 = sbr.rel (!%p13_p0) target bundleno = 1 (0x1), region = 40 }
 0x10a   : > { %v530_v59 = vpop.eup %529 }
 0x10b   : > { %v355_v1 = vmul.f32 %v530_v59, %v528_v58  }
 0x10d   : > { %359 = vst.msk [vmem:[%s357_s22] sm:$0x3] %vm358_vm2, %v355_v1 }

// kernel: transducer_forward.8
= control target key start
LH: loop header
LB: loop body
LE: loop exit
PB: predicated region body
PF: predicated region fallthrough
CT: control target
= control target key end

     0   :  { %v192_v0 = vmov 0.0   ;;  %vm193_vm0 = vmmov 0   ;;  %vm135_vm1 = vcmask 261120   ;;  %s250_s1 = inlined_call_operand.vmem [shape: bf16[128,32], index: 1, kind: input, shape index: {}]   ;;  %s251_s0 = inlined_call_operand.vmem [shape: bf16[16,128], index: 0, kind: input, shape index: {}]   ;;  %s252_s2 = inlined_call_operand.vmem [shape: f32[1,32], index: 2, kind: input, shape index: {}]   ;;  %s253_s3 = inlined_call_operand.vmem [shape: f32[16,32], index: 3, kind: output, shape index: {}]  }
   0x1   :  { %161 = vmatprep.subr.bf16.mxu0 %v192_v0  ;;  %v183_v1 = vld [vmem:[%s250_s1] sm:$0xff]   ;;  %177 = vmatprep.mubr.msk.bf16.mxu0 %vm193_vm0, %v192_v0  ;;  %v184_v2 = vld [vmem:[%s250_s1 + $0x8] sm:$0xff]   ;;  %v185_v3 = vld [vmem:[%s250_s1 + $0x10] sm:$0xff]  }
   0x2   :  { %162 = vmatpush3.bf16.msra.mxu0 %v183_v1  ;;  %v186_v4 = vld [vmem:[%s250_s1 + $0x18] sm:$0xff]   ;;  %v187_v5 = vld [vmem:[%s250_s1 + $0x20] sm:$0xff]   ;;  %v188_v6 = vld [vmem:[%s250_s1 + $0x28] sm:$0xff]  }
   0x3   :  { %163 = vmatprep.subr.bf16.mxu0 %v192_v0  ;;  %v189_v7 = vld [vmem:[%s250_s1 + $0x30] sm:$0xff]   ;;  %v190_v8 = vld [vmem:[%s250_s1 + $0x38] sm:$0xff]   ;;  %v191_v9 = vld [vmem:[%s251_s0] sm:$0xff]  }
   0x4   :  { %v142_v10 = vld [vmem:[%s252_s2] ss:$0 sm:$0xff] }
   0x6   :  { %164 = vmatpush3.bf16.msra.mxu0 %v184_v2 }
   0x7   :  { %165 = vmatprep.subr.bf16.mxu0 %v192_v0 }
   0xa   :  { %166 = vmatpush3.bf16.msra.mxu0 %v185_v3 }
   0xb   :  { %167 = vmatprep.subr.bf16.mxu0 %v192_v0 }
   0xe   :  { %168 = vmatpush3.bf16.msra.mxu0 %v186_v4 }
   0xf   :  { %169 = vmatprep.subr.bf16.mxu0 %v192_v0 }
  0x12   :  { %170 = vmatpush3.bf16.msra.mxu0 %v187_v5 }
  0x13   :  { %171 = vmatprep.subr.bf16.mxu0 %v192_v0 }
  0x16   :  { %172 = vmatpush3.bf16.msra.mxu0 %v188_v6 }
  0x17   :  { %173 = vmatprep.subr.bf16.mxu0 %v192_v0 }
  0x1a   :  { %174 = vmatpush3.bf16.msra.mxu0 %v189_v7 }
  0x1b   :  { %175 = vmatprep.subr.bf16.mxu0 %v192_v0 }
  0x1e   :  { %176 = vmatpush3.bf16.msra.mxu0 %v190_v8 }
  0x21   :  { %178 = vmatmul.mubr.bf16.vlgmr.msra.gmra.mrb[0].mxu0 %v191_v9 }
  0xf4   :  { %v128_v11 = vpop.f32.mrb[0].mxu0 }
  0xf5   :  { %v129_v12 = vadd.f32 %v142_v10, %v128_v11  ;;  %v179_v13 = vpop.f32.mrb[1].mxu0 }
  0xf6   :  { %v131_v14 = vpop.f32.mrb[2].mxu0 }
  0xf7   :  { %136 = vst.msk [vmem:[%s253_s3] sm:$0xff] %vm135_vm1, %v129_v12  ;;  %v132_v15 = vadd.f32 %v142_v10, %v131_v14  ;;  %v180_v16 = vpop.f32.mrb[3].mxu0 }
  0xf9   :  { %137 = vst.msk [vmem:[%s253_s3 + $0x8] sm:$0xff] %vm135_vm1, %v132_v15 }

// kernel: transducer_forward.14
= control target key start
LH: loop header
LB: loop body
LE: loop exit
PB: predicated region body
PF: predicated region fallthrough
CT: control target
= control target key end

     0   :  { %s892_s15 = smov 0   ;;  %s894_s16 = smov 0   ;;  %s985_s0 = inlined_call_operand.vmem [shape: f32[2,8,32], index: 0, kind: input, shape index: {}]   ;;  %s986_s1 = inlined_call_operand.vmem [shape: f32[2,5,32], index: 1, kind: input, shape index: {}]   ;;  %s987_s2 = inlined_call_operand.vmem [shape: f32[2,5,32], index: 2, kind: input, shape index: {}]   ;;  %s988_s3 = inlined_call_operand.vmem [shape: f32[2,5,8], index: 3, kind: output, shape index: {0}]   ;;  %s989_s4 = inlined_call_operand.vmem [shape: f32[2,5,8], index: 4, kind: output, shape index: {1}]  }
   0x1   :  { %s896_s17 = smov 0  }
   0x2 LB: > { %s27_s18 = sadd.s32 1, %s857_s16  ;;  %p761_p0 = scmp.ge.s32.totalorder %s861_s17, 1  ;;  %s861_s17 = sphi %s896_s17, %s15_s17   ;;  %s857_s16 = sphi %s894_s16, %s991_s16   ;;  %s853_s15 = sphi %s892_s15, %s990_s15  }
   0x3   : > { %p29_p1 = scmp.ge.s32.totalorder %s27_s18, 2  ;;  %p203_p2 = scmp.lt.s32.totalorder %s861_s17, 3 }
   0x5   : > { %s993_s18 = smov (%p29_p1, %s27_s18), 0  ;;  %p204_p3 = pnand %p761_p0, %p203_p2 }
   0x6   : > { %p248_p4 = scmp.lt.s32.totalorder (!%p204_p3), %s853_s15, 1  ;;  %v285_v0 = vlaneseq (!%p204_p3)  ;;  %v863_v1 = vmov (!%p204_p3), 1966171168   ;;  %v864_v3 = vmov (!%p204_p3), 0.0   ;;  %vm865_vm0 = vmmov (!%p204_p3), 0  }
   0x7   : > { %207 = sbr.rel (%p204_p3) target bundleno = 359 (0x167), region = 32  ;;  %v283_v2 = vunpack.c.l.s4 (!%p204_p3), %v863_v1  ;;  %778 = vmatprep.subr.mxu0 (!%p204_p3), %v864_v3  ;;  %783 = vmatprep.subr.mxu1 (!%p204_p3), %v864_v3  ;;  %vm350_vm2 = vcmask (!%p204_p3), 261120   ;;  %v866_v38 = vmov (!%p204_p3), 0   ;;  %vm493_vm3 = vcmask (!%p204_p3), 258048  }
   0x8   : > { %v286_v4 = vshrl.u32 (!%p204_p3), %v285_v0, 7  ;;  %780 = vmatprep.mubr.msk.f32.mxu0 (!%p204_p3), %vm865_vm0, %v864_v3  ;;  %v412_v5 = vand.u32 (!%p204_p3), 127, %v285_v0  ;;  %785 = vmatprep.mubr.msk.f32.mxu1 (!%p204_p3), %vm865_vm0, %v864_v3  ;;  %vm531_vm4 = vcmask (!%p204_p3), 1041409   ;;  %vm533_vm5 = vcmask (!%p204_p3), 1042434  }
   0x9   : > { %v284_v6 = vunpack.c.0.s8 (!%p204_p3), %v283_v2  ;;  %816 = vset.pattern.permute.xlu1 (!%p204_p3), %v866_v38  ;;  %817 = vset.pattern.permute.xlu0 (!%p204_p3), %v866_v38  ;;  %vm535_vm6 = vcmask (!%p204_p3), 1043459   ;;  %vm537_vm7 = vcmask (!%p204_p3), 1044484   ;;  %vm541_vm8 = vcmask (!%p204_p3), 61440  }
   0xa   : > { %vm413_vm1 = vcmp.eq.s32.totalorder (!%p204_p3), %v412_v5, 0  ;;  %v912_v7 = vsub.s32 (!%p204_p3), %v412_v5, %v286_v4  ;;  %v929_v12 = vsub.s32 (!%p204_p3), 0, %v286_v4 }
   0xb   : > { %v287_v8 = vsub.s32 (!%p204_p3), %v284_v6, %v286_v4  ;;  %v767_v14 = vsel (!%p204_p3), %vm413_vm1, 1.0, %v864_v3 }
   0xe   : > { %s995_s15 = smov (!%p248_p4, %s853_s15), 1 }
   0xf   : > { %s910_s19 = sshll.u32 %s995_s15, 3 }
  0x10   : > { %s254_s22 = scalar_lea.vmem %s985_s0, %s910_s19  ;;  %s258_s25 = scalar_lea.vmem %s986_s1, %s910_s19 }
  0x11   : > { %v277_v9 = vld [vmem:[%s254_s22] sm:$0xff]  ;;  %s262_s28 = scalar_lea.vmem %s987_s2, %s910_s19  ;;  %s269_s5 = scalar_lea.vmem %s988_s3, %s910_s19 }
  0x12   : > { %v922_v10 = vld [vmem:[%s258_s25] sm:$0x1f]  ;;  %779 = vmatpush3.xpose.msk.msra.mxu0 %vm350_vm2, %v277_v9  ;;  %784 = vmatpush3.xpose.msk.msra.mxu1 %vm350_vm2, %v277_v9  ;;  %s276_s8 = scalar_lea.vmem %s989_s4, %s910_s19 }
  0x13   : > { %v288_v11 = vrot.slane %v922_v10, %v287_v8  ;;  %v281_v13 = vcombine.high %v922_v10, %v922_v10  ;;  %v935_v15 = vld [vmem:[%s262_s28] sm:$0x1f] }
  0x14   : > { %v492_v62 = vmul.f32 %v935_v15, %v922_v10 }
  0x15   : > { %v303_v16 = vrot.slane %v288_v11, %v287_v8  ;;  %v296_v17 = vcombine.high %v288_v11, %v288_v11  ;;  %v295_v18 = vrot.slane %v281_v13, %v287_v8  ;;  %781 = vmatmul.mubr.msk.f32.vlgmr.msra.gmra.mrb[0].mxu0 %vm350_vm2, %v767_v14  ;;  %786 = vmatmul.mubr.msk.f32.vlgmr.msra.gmra.mrb[0].mxu1 %vm350_vm2, %v935_v15 }
  0x16   : > { %v494_v1 = vsel %vm493_vm3, %v492_v62, 0.0 }
  0x17   : > { %v323_v19 = vrot.slane %v303_v16, %v929_v12  ;;  %v318_v20 = vcombine.high %v303_v16, %v303_v16  ;;  %v317_v21 = vrot.slane %v296_v17, %v287_v8  ;;  %v310_v22 = vrot.slane %v295_v18, %v287_v8 }
  0x19   : > { %v345_v23 = vadd.f32 %v323_v19, %v277_v9  ;;  %v331_v24 = vrot.slane %v318_v20, %v929_v12  ;;  %v327_v25 = vrot.slane %v317_v21, %v929_v12  ;;  %v319_v26 = vcombine.high %v317_v21, %v317_v21 }
  0x1a   : > { %v339_v27 = vrot.slane %v310_v22, %v929_v12 }
  0x1b   : > { %v351_v28 = vsel %vm350_vm2, %v345_v23, -inf  ;;  %v347_v29 = vadd.f32 %v331_v24, %v277_v9  ;;  %v346_v30 = vadd.f32 %v327_v25, %v277_v9  ;;  %v335_v31 = vrot.slane %v319_v26, %v929_v12 }
  0x1c   : > { %352 = vmax.xlane.f32.xlu0 %v351_v28  ;;  %v349_v35 = vadd.f32 %v339_v27, %v277_v9 }
  0x1d   : > { %v357_v32 = vsel %vm350_vm2, %v347_v29, -inf  ;;  %v354_v33 = vsel %vm350_vm2, %v346_v30, -inf  ;;  %v348_v34 = vadd.f32 %v335_v31, %v277_v9 }
  0x1e   : > { %358 = vmax.xlane.f32.xlu1 %v357_v32  ;;  %v363_v37 = vsel %vm350_vm2, %v349_v35, -inf }
  0x1f   : > { %v360_v36 = vsel %vm350_vm2, %v348_v34, -inf }
  0x20   : > { %355 = vmax.xlane.f32.xlu0 %v354_v33 }
  0x22   : > { %361 = vmax.xlane.f32.xlu1 %v360_v36 }
  0x24   : > { %364 = vmax.xlane.f32.xlu0 %v363_v37 }
  0xa9   : > { %v353_v39 = vpop.xlane.xlu0 %352 }
  0xaa   : > { %v366_v40 = vsub.f32 %v345_v23, %v353_v39 }
  0xab   : > { %v359_v41 = vpop.xlane.xlu1 %358 }
  0xac   : > { %v371_v42 = vmul.f32 1.442695, %v366_v40  ;;  %v368_v43 = vsub.f32 %v347_v29, %v359_v41 }
  0xad   : > { %v356_v44 = vpop.xlane.xlu0 %355 }
  0xae   : > { %819 = vpow2.f32 %v371_v42  ;;  %v375_v45 = vmul.f32 1.442695, %v368_v43  ;;  %v367_v46 = vsub.f32 %v346_v30, %v356_v44 }
  0xaf   : > { %v950_v47 = vpop.xlane.xlu1 %361 }
  0xb0   : > { %821 = vpow2.f32 %v375_v45  ;;  %v373_v48 = vmul.f32 1.442695, %v367_v46  ;;  %v369_v49 = vsub.f32 %v348_v34, %v950_v47 }
  0xb1   : > { %v365_v50 = vpop.xlane.xlu0 %364 }
  0xb2   : > { %823 = vpow2.f32 %v373_v48  ;;  %v377_v51 = vmul.f32 1.442695, %v369_v49  ;;  %v370_v52 = vsub.f32 %v349_v35, %v365_v50 }
  0xb4   : > { %825 = vpow2.f32 %v377_v51  ;;  %v379_v53 = vmul.f32 1.442695, %v370_v52 }
  0xb6   : > { %827 = vpow2.f32 %v379_v53 }
  0xb8   : > { %v820_v54 = vpop.eup %819 }
  0xb9   : > { %v381_v55 = vsel %vm350_vm2, %v820_v54, 0.0 }
  0xba   : > { %v822_v56 = vpop.eup %821  ;;  %382 = vadd.xlane.f32.xlu1 %v381_v55 }
  0xbb   : > { %v387_v57 = vsel %vm350_vm2, %v822_v56, 0.0 }
  0xbc   : > { %v824_v58 = vpop.eup %823 }
  0xbd   : > { %v384_v59 = vsel %vm350_vm2, %v824_v58, 0.0 }
  0xbe   : > { %v826_v60 = vpop.eup %825  ;;  %388 = vadd.xlane.f32.xlu1 %v387_v57  ;;  %385 = vadd.xlane.f32.xlu0 %v384_v59 }
  0xbf   : > { %v390_v61 = vsel %vm350_vm2, %v826_v60, 0.0 }
  0xc0   : > { %v828_v63 = vpop.eup %827 }
  0xc1   : > { %v393_v0 = vsel %vm350_vm2, %v828_v63, 0.0 }
  0xc2   : > { %391 = vadd.xlane.f32.xlu0 %v390_v61  ;;  %394 = vadd.xlane.f32.xlu1 %v393_v0 }
  0xc6   : > { %495 = vadd.xlane.f32.xlu0 %v494_v1 }
  0xd3   : > { %502 = vperm.xlu1 %816, %v922_v10  }
  0xe8   : > { %v488_v2 = vpop.f32.mrb[0].mxu0  ;;  %v612_v3 = vpop.f32.mrb[0].mxu1 }
  0xe9   : > { %v782_v4 = vpop.f32.mrb[1].mxu0  ;;  %v787_v5 = vpop.f32.mrb[1].mxu1  ;;  %v500_v28 = vrot.slane %v488_v2, %v929_v12 }
 0x147   : > { %v383_v6 = vpop.xlane.xlu1 %382 }
 0x148   : > { %829 = vlog2.f32 %v383_v6 }
 0x14b   : > { %v389_v8 = vpop.xlane.xlu1 %388  ;;  %v386_v9 = vpop.xlane.xlu0 %385 }
 0x14c   : > { %831 = vlog2.f32 %v389_v8 }
 0x14d   : > { %833 = vlog2.f32 %v386_v9 }
 0x14f   : > { %v395_v11 = vpop.xlane.xlu1 %394  ;;  %v392_v13 = vpop.xlane.xlu0 %391 }
 0x150   : > { %835 = vlog2.f32 %v395_v11 }
 0x151   : > { %837 = vlog2.f32 %v392_v13 }
 0x152   : > { %v830_v14 = vpop.eup %829 }
 0x153   : > { %v397_v15 = vmul.f32 0.6931472, %v830_v14  ;;  %v503_v31 = vpop.permute.xlu1 %502  ;;  %v496_v32 = vpop.xlane.xlu0 %495 }
 0x154   : > { %v505_v37 = vadd.f32 %v503_v31, %v500_v28  ;;  %v613_v38 = vadd.f32 %v612_v3, %v496_v32 }
 0x155   : > { %v406_v10 = vadd.f32 %v397_v15, %v353_v39 }
 0x156   : > { %v832_v16 = vpop.eup %831 }
 0x157   : > { %v834_v17 = vpop.eup %833  ;;  %v401_v18 = vmul.f32 0.6931472, %v832_v16  ;;  %v514_v25 = vrot.slane %v406_v10, %v912_v7 }
 0x158   : > { %v399_v19 = vmul.f32 0.6931472, %v834_v17 }
 0x159   : > { %v408_v20 = vadd.f32 %v401_v18, %v359_v41 }
 0x15a   : > { %v836_v21 = vpop.eup %835  ;;  %v407_v22 = vadd.f32 %v399_v19, %v356_v44 }
 0x15b   : > { %v838_v23 = vpop.eup %837  ;;  %v405_v24 = vmul.f32 0.6931472, %v836_v21  ;;  %v522_v29 = vrot.slane %v408_v20, %v912_v7 }
 0x15c   : > { %v518_v26 = vrot.slane %v407_v22, %v912_v7  ;;  %v403_v27 = vmul.f32 0.6931472, %v838_v23 }
 0x15d   : > { %v410_v30 = vadd.f32 %v405_v24, %v365_v50 }
 0x15e   : > { %v409_v33 = vadd.f32 %v403_v27, %v950_v47  ;;  %v532_v34 = vsel %vm531_vm4, %v518_v26, %v514_v25 }
 0x15f   : > { %v530_v35 = vrot.slane %v410_v30, %v912_v7  ;;  %v534_v12 = vsel %vm533_vm5, %v522_v29, %v532_v34 }
 0x160   : > { %v526_v36 = vrot.slane %v409_v33, %v912_v7 }
 0x162   : > { %v536_v39 = vsel %vm535_vm6, %v526_v36, %v534_v12 }
 0x163   : > { %v538_v40 = vsel %vm537_vm7, %v530_v35, %v536_v39 }
 0x164   : > { %v540_v41 = vsub.f32 %v505_v37, %v538_v40  ;;  %v616_v42 = vsub.f32 %v613_v38, %v538_v40 }
 0x166   : > { %542 = vst.msk [vmem:[%s269_s5] sm:$0x1f] %vm541_vm8, %v540_v41  ;;  %617 = vst.msk [vmem:[%s276_s8] sm:$0x1f] %vm541_vm8, %v616_v42 }
 0x167 PF: > { %s15_s17 = sadd.s32 1, %s861_s17   ;;  %s990_s15 = smov %s857_s16 }
 0x168   : > { %p12_p5 = scmp.ge.s32.totalorder %s15_s17, 4   ;;  %s991_s16 = smov %s993_s18 }
 0x16a   :  { %14 = sbr.rel (!%p12_p5) target bundleno = 2 (0x2), region = 80 }

// kernel: transducer_forward.15
= control target key start
LH: loop header
LB: loop body
LE: loop exit
PB: predicated region body
PF: predicated region fallthrough
CT: control target
= control target key end

     0   :  { %v176_v0 = vmov 0   ;;  %vm27_vm0 = vcmask 41984   ;;  %v177_v4 = vmov -1e+30   ;;  %v17_v7 = vlaneseq  ;;  %s227_s19 = smov 1   ;;  %s254_s1 = inlined_call_operand.vmem [shape: s32[2,1], index: 1, kind: input, shape index: {}]   ;;  %s255_s0 = inlined_call_operand.vmem [shape: s32[2,1], index: 0, kind: input, shape index: {}]   ;;  %s256_s3 = inlined_call_operand.vmem [shape: f32[12,2,5], index: 3, kind: input, shape index: {}]   ;;  %s257_s4 = inlined_call_operand.vmem [shape: f32[2,5], index: 4, kind: output, shape index: {}]   ;;  %s258_s2 = inlined_call_operand.vmem [shape: f32[12,2,5], index: 2, kind: input, shape index: {}]  }
   0x1   :  { %144 = vset.pattern.permute.xlu0 %v176_v0  ;;  %v19_v1 = vld [vmem:[%s254_s1] sm:$0x3]  ;;  %28 = vst.msk [vmem:[#allocation2] sm:$0x3] %vm27_vm0, %v177_v4 }
   0x2   :  { %v20_v2 = vld [vmem:[%s255_s0] sm:$0x3]  ;;  %24 = vperm.xlu0 %144, %v19_v1   ;;  %v214_v8 = vand.u32 127, %v17_v7 }
   0x3   :  { %v21_v3 = vadd.s32 %v20_v2, %v19_v1  ;;  %v38_v11 = vld [vmem:[%s258_s2] sm:$0x3] }
   0x4   :  { %vm29_vm2 = vcmp.eq.s32.totalorder %v214_v8, 0 }
   0x5   :  { %v211_v5 = vadd.s32 4294967295, %v21_v3  ;;  %v30_v10 = vsel %vm29_vm2, 0.0, %v177_v4  }
   0x6   :  { %v39_v12 = vadd.f32 %v38_v11, %v30_v10  ;;  %v168_v16 = vmov %v30_v10  }
   0x7   :  { %vm31_vm1 = vcmp.eq.s32.totalorder %v211_v5, 0 }
   0x8   :  { %v32_v6 = vsel %vm31_vm1, 1, %v176_v0 }
   0x9   :  { %34 = vperm.xlu0 %144, %v32_v6  }
  0x81   :  { %v217_v9 = vpop.permute.xlu0 %24 }
  0x82   :  { %vm26_vm3 = vcmp.eq.s32.totalorder %v214_v8, %v217_v9 }
  0x88   :  { %v35_v13 = vpop.permute.xlu0 %34 }
  0x89   :  { %vm36_vm4 = vcmp.eq.s32.totalorder %v35_v13, 1 }
  0x8a   :  { %vm37_vm5 = vmand %vm36_vm4, %vm26_vm3 }
  0x8b   :  { %v40_v14 = vsel %vm37_vm5, %v39_v12, 0.0  }
  0x8c   :  { %v164_v15 = vmov %v40_v14  }
  0x8d LB: > { %v178_v17 = vmov 0   ;;  %s113_s20 = sadd.s32 4294967295, %s174_s19  ;;  %v75_v18 = vstv %s174_s19  ;;  %s179_s28 = smov 1   ;;  %vm61_vm7 = vcmask 41992   ;;  %s174_s19 = sphi %s227_s19, %s46_s19   ;;  %v170_v16 = vphi %v168_v16, %v74_v16   ;;  %v166_v15 = vphi %v164_v15, %v165_v15  }
  0x8e   : > { %145 = vset.pattern.permute.xlu0 %v178_v17  ;;  %s114_s21 = sshll.u32 %s113_s20, 1  ;;  %vm76_vm6 = vcmp.eq.s32.totalorder %v211_v5, %v75_v18  ;;  %s115_s29 = sshll.u32 %s174_s19, 1 }
  0x8f   : > { %s51_s24 = scalar_lea.vmem %s258_s2, %s114_s21  ;;  %s54_s27 = scalar_lea.vmem %s256_s3, %s114_s21  ;;  %v77_v23 = vsel %vm76_vm6, 1, %v178_v17 }
  0x90   : > { %v52_v19 = vld [vmem:[%s51_s24] sm:$0x3]  ;;  %s84_s6 = scalar_lea.vmem %s258_s2, %s115_s29  ;;  %s46_s19 = sadd.s32 1, %s174_s19  }
  0x91   : > { %v55_v20 = vld [vmem:[%s54_s27] sm:$0x3]  ;;  %v53_v22 = vadd.f32 %v170_v16, %v52_v19  ;;  %p43_p0 = scmp.ge.s32.totalorder %s46_s19, 12  }
  0x92   : > { %v56_v21 = vadd.f32 %v170_v16, %v55_v20  ;;  %v85_v37 = vld [vmem:[%s84_s6] sm:$0x3]  ;;  %vm89_vm10 = vcmask (%p43_p0), 33792  }
  0x94   : > { %58 = vrot.lane.b32.xlu0 %v56_v21, %s179_s28 }
  0x98   : > { %79 = vperm.xlu0 %145, %v77_v23  }
 0x106   : > { %v59_v24 = vpop.permute.xlu0 %58 }
 0x107   : > { %62 = vst.msk [vmem:[#allocation2] sm:$0x3] %vm61_vm7, %v59_v24 }
 0x10e   : > { %v63_v25 = vld [vmem:[#allocation2] sm:$0x3] }
 0x10f   : > { %v64_v26 = vmax.f32 %v53_v22, %v63_v25 }
 0x111   : > { %v65_v27 = vsub.f32 %v53_v22, %v64_v26  ;;  %v68_v28 = vsub.f32 %v63_v25, %v64_v26 }
 0x113   : > { %v66_v29 = vmul.f32 1.442695, %v65_v27  ;;  %v69_v30 = vmul.f32 1.442695, %v68_v28 }
 0x115   : > { %146 = vpow2.f32 %v66_v29 }
 0x116   : > { %148 = vpow2.f32 %v69_v30 }
 0x117   : > { %v80_v34 = vpop.permute.xlu0 %79 }
 0x118   : > { %vm81_vm8 = vcmp.eq.s32.totalorder %v80_v34, 1 }
 0x119   : > { %vm82_vm9 = vmand %vm81_vm8, %vm26_vm3 }
 0x11f   : > { %v147_v31 = vpop.eup %146 }
 0x120   : > { %v149_v32 = vpop.eup %148 }
 0x121   : > { %v71_v33 = vadd.f32 %v149_v32, %v147_v31 }
 0x123   : > { %150 = vlog2.f32 %v71_v33 }
 0x12d   : > { %v151_v35 = vpop.eup %150 }
 0x12e   : > { %v73_v36 = vmul.f32 0.6931472, %v151_v35 }
 0x130   : > { %v74_v16 = vadd.f32 %v73_v36, %v64_v26  }
 0x131   :  { %45 = sbr.rel (!%p43_p0) target bundleno = 141 (0x8d), region = 46 }
 0x132   : > { %v86_v38 = vadd.f32 %v85_v37, %v74_v16 }
 0x134   : > { %v87_v39 = vsel %vm82_vm9, %v86_v38, 0.0 }
 0x135   : > { %v88_v40 = vadd.f32 %v166_v15, %v87_v39  }
 0x137   : > { %v165_v15 = vmov %v88_v40   ;;  %90 = vst.msk [vmem:[%s257_s4] sm:$0x3] (%p43_p0), %vm89_vm10, %v88_v40 }

</bundles_post_ra>
